<compile_context>
chip_gen: v7x
topology: tpu7x:2x2x1
jax: 0.10.0
libtpu: 0.0.40
codegen_flags: <defaults>
</compile_context>

<pallas_src>
import functools
import math

import jax
import jax.numpy as jnp
from jax.experimental import pallas as pl
from jax.experimental.pallas import tpu as pltpu


# ---------------------------- Pallas kernels ----------------------------

def _se_fused_kernel(x_ref, w1_ref, w2_ref, o_ref, *, inv_hw):
    """Single-pass SE for one batch element.

    x_ref / o_ref : (1, C, HW) block in x's native dtype (slab fits VMEM)
    w1_ref        : (Cr, C)  f32  (torch net[0].weight)
    w2_ref        : (C, Cr)  f32  (torch net[2].weight)
    """
    # Squeeze: channel-on-sublane column (C, 1), accumulate in f32.
    pooled = jnp.sum(x_ref[0].astype(jnp.float32), axis=1, keepdims=True) * inv_hw
    # Excitation: W1 @ pooled -> relu -> W2 @ z -> sigmoid, all column-shaped
    # (no relayouts; the result is already (C, 1) for the broadcast multiply).
    z = jnp.maximum(
        jnp.dot(w1_ref[...], pooled, preferred_element_type=jnp.float32), 0.0)
    gate = jax.nn.sigmoid(
        jnp.dot(w2_ref[...], z, preferred_element_type=jnp.float32))
    # Scale: re-read the slab from VMEM (cheap) so it is not kept live across
    # the gate computation (avoids a spilled second copy of the slab).
    o_ref[0] = x_ref[0] * gate.astype(o_ref.dtype)


def _pool_sum_kernel(x_ref, psum_ref):
    """Per-(b, c) spatial sum accumulated across the HW-tile (reduction) axis.

    x_ref:    (1, C, hw_tile) native dtype
    psum_ref: (1, C, 1) f32 resident accumulator (same block across axis 1).
    """
    @pl.when(pl.program_id(1) == 0)
    def _():
        psum_ref[...] = jnp.zeros_like(psum_ref)

    psum_ref[...] += jnp.sum(x_ref[...].astype(jnp.float32), axis=2, keepdims=True)


def _se_apply_kernel(x_ref, gate_ref, o_ref):
    """Per-channel gating: (1, C, hw_tile) * (1, C, 1) broadcast multiply (VPU)."""
    o_ref[...] = x_ref[...] * gate_ref[...]


# ---------------------------- wrapper ----------------------------

def _hw_budgets():
    """(block budget bytes, vmem_limit bytes) tuned per TPU generation."""
    kind = ""
    try:
        kind = jax.devices()[0].device_kind.lower()
    except Exception:
        pass
    if "v7" in kind or "7x" in kind:
        return 6 << 20, 48 << 20   # 64 MiB VMEM: mid-size blocks, headroom
    if "v6" in kind or "v5" in kind:
        return 8 << 20, 64 << 20   # 128 MiB VMEM: bigger blocks amortize step cost
    return 4 << 20, 40 << 20       # unknown chip: conservative


def _pick_hw_tile(C, HW, itemsize, budget):
    """Largest multiple-of-128 divisor of HW whose (C, hw_tile) block fits budget."""
    if HW % 128 == 0:
        best = 128
        for t in range(128, HW + 1, 128):
            if HW % t == 0 and C * t * itemsize <= budget:
                best = t
        return best
    # TODO(synk): pad HW up to a multiple of 128 for huge non-128-divisible maps.
    return HW  # full extent is always a legal block


def squeeze_excitation(x, w1, w2, *, use_fused=None, donate_x=False):
    """Squeeze & Excitation forward.

    x  : (B, C, H, W) NCHW, streamed in its native float dtype.
    w1 : (C//r, C)  == torch net[0].weight (bias-free)
    w2 : (C, C//r)  == torch net[2].weight (bias-free)
    """
    B, C, H, W = x.shape
    HW = H * W
    Cr = w1.shape[0]
    assert w1.shape == (Cr, C) and w2.shape == (C, Cr), (w1.shape, w2.shape)

    itemsize = x.dtype.itemsize
    block_budget, vmem_limit = _hw_budgets()
    xf = x.reshape(B, C, HW)              # free reshape for contiguous NCHW
    w1 = w1.astype(jnp.float32)
    w2 = w2.astype(jnp.float32)
    inv_hw = 1.0 / float(HW)

    slab_bytes = C * HW * itemsize
    if use_fused is None:
        # slab is double-buffered on both input and output sides
        use_fused = slab_bytes <= vmem_limit // 5

    io_alias = {0: 0} if donate_x else {}

    if use_fused:
        out = pl.pallas_call(
            functools.partial(_se_fused_kernel, inv_hw=inv_hw),
            out_shape=jax.ShapeDtypeStruct((B, C, HW), x.dtype),
            grid=(B,),
            in_specs=[pl.BlockSpec((1, C, HW), lambda b: (b, 0, 0)),
                      pl.BlockSpec((Cr, C), lambda b: (0, 0)),
                      pl.BlockSpec((C, Cr), lambda b: (0, 0))],
            out_specs=pl.BlockSpec((1, C, HW), lambda b: (b, 0, 0)),
            compiler_params=pltpu.CompilerParams(
                dimension_semantics=("parallel",),
                vmem_limit_bytes=vmem_limit),
            cost_estimate=pl.CostEstimate(
                flops=2 * x.size + 4 * B * C * Cr,
                transcendentals=B * C,
                bytes_accessed=2 * x.size * itemsize + 2 * C * Cr * 4),
            input_output_aliases=io_alias,
        )(xf, w1, w2)
        return out.reshape(B, C, H, W)

    # ---------------- tiled path: pool -> (XLA glue MLP) -> apply ----------------
    hw_tile = _pick_hw_tile(C, HW, itemsize, block_budget)
    n_hw = HW // hw_tile

    x_spec = pl.BlockSpec((1, C, hw_tile), lambda b, t: (b, 0, t))
    vec_spec = pl.BlockSpec((1, C, 1), lambda b, t: (b, 0, 0))

    # pass 1: per-(b, c) spatial sum, f32 resident accumulator over the tile axis
    psum = pl.pallas_call(
        _pool_sum_kernel,
        out_shape=jax.ShapeDtypeStruct((B, C, 1), jnp.float32),
        grid=(B, n_hw),
        in_specs=[x_spec],
        out_specs=vec_spec,
        compiler_params=pltpu.CompilerParams(
            dimension_semantics=("parallel", "arbitrary"),
            vmem_limit_bytes=vmem_limit),
        cost_estimate=pl.CostEstimate(
            flops=x.size, transcendentals=0,
            bytes_accessed=x.size * itemsize + B * C * 4),
    )(xf)

    # excitation MLP: << 1% of the work, plain XLA glue (no dedicated launch)
    pooled = psum[:, :, 0] * inv_hw                                  # (B, C) f32
    z = jnp.maximum(pooled @ w1.T, 0.0)                              # (B, Cr)
    gate = jax.nn.sigmoid(z @ w2.T).astype(x.dtype).reshape(B, C, 1)

    # pass 2: per-channel gating, lane-dense blocks / unmasked stores
    out = pl.pallas_call(
        _se_apply_kernel,
        out_shape=jax.ShapeDtypeStruct((B, C, HW), x.dtype),
        grid=(B, n_hw),
        in_specs=[x_spec, vec_spec],
        out_specs=x_spec,
        compiler_params=pltpu.CompilerParams(
            dimension_semantics=("parallel", "parallel"),
            vmem_limit_bytes=vmem_limit),
        cost_estimate=pl.CostEstimate(
            flops=x.size, transcendentals=0,
            bytes_accessed=2 * x.size * itemsize + B * C * itemsize),
        input_output_aliases=io_alias,
    )(xf, gate)
    return out.reshape(B, C, H, W)


# ---------------------------- main ----------------------------

if __name__ == "__main__":
    key = jax.random.PRNGKey(0)
    kx, k1, k2 = jax.random.split(key, 3)

    B, C, H, W = 2, 32, 32, 32
    r = 8
    Cr = C // r

    x = jax.random.normal(kx, (B, C, H, W), jnp.float32)
    # Torch-layout, bias-free SE weights: w1 = net[0].weight, w2 = net[2].weight.
    w1 = jax.random.normal(k1, (Cr, C), jnp.float32) * (1.0 / math.sqrt(C))
    w2 = jax.random.normal(k2, (C, Cr), jnp.float32) * (1.0 / math.sqrt(Cr))

    # Pure-JAX reference (same math, f32).
    pooled = jnp.mean(x, axis=(2, 3))
    gate = jax.nn.sigmoid(jnp.maximum(pooled @ w1.T, 0.0) @ w2.T)
    ref = x * gate[:, :, None, None]

    fused_fwd = jax.jit(functools.partial(squeeze_excitation, use_fused=True))
    tiled_fwd = jax.jit(functools.partial(squeeze_excitation, use_fused=False))

    out_fused = jax.block_until_ready(fused_fwd(x, w1, w2))
    out_tiled = jax.block_until_ready(tiled_fwd(x, w1, w2))
    assert out_fused.shape == (B, C, H, W), out_fused.shape

    for out in (out_fused, out_tiled):
        err = float(jnp.max(jnp.abs(out - ref)))
        assert jnp.allclose(out, ref, atol=1e-4, rtol=1e-4), err

    print("KERNEL_OK")
</pallas_src>

<mosaic_0001>
module attributes {stable_mosaic.version = 11 : i64} {
  func.func @_se_fused_kernel(%arg0: i32, %arg1: memref<1x32x1024xf32, #tpu.memory_space<vmem>>, %arg2: memref<4x32xf32, #tpu.memory_space<vmem>>, %arg3: memref<32x4xf32, #tpu.memory_space<vmem>>, %arg4: memref<1x32x1024xf32, #tpu.memory_space<vmem>>) attributes {dimension_semantics = [#tpu.dimension_semantics<parallel>], iteration_bounds = array<i64: 2>, scalar_prefetch = 0 : i64, scratch_operands = 0 : i64, tpu.core_type = #tpu.core_type<tc>, window_params = [{transform_indices = @transform_0, window_bounds = array<i64: 1, 32, 1024>}, {pipeline_mode = #tpu.pipeline_mode<synchronous>, transform_indices = @transform_1, window_bounds = array<i64: 4, 32>}, {pipeline_mode = #tpu.pipeline_mode<synchronous>, transform_indices = @transform_2, window_bounds = array<i64: 32, 4>}, {transform_indices = @transform_3, window_bounds = array<i64: 1, 32, 1024>}]} {
    %c0 = arith.constant 0 : index
    %c0_0 = arith.constant 0 : index
    %c0_1 = arith.constant 0 : index
    %0 = vector.load %arg1[%c0, %c0_0, %c0_1] : memref<1x32x1024xf32, #tpu.memory_space<vmem>>, vector<1x32x1024xf32>
    %1 = vector.shape_cast %0 : vector<1x32x1024xf32> to vector<32x1024xf32>
    %cst = arith.constant dense<0.000000e+00> : vector<32xf32>
    %2 = vector.multi_reduction <add>, %1, %cst [1] : vector<32x1024xf32> to vector<32xf32>
    %3 = vector.shape_cast %2 : vector<32xf32> to vector<32x1xf32>
    %cst_2 = arith.constant 9.765625E-4 : f32
    %4 = vector.broadcast %cst_2 : f32 to vector<32x1xf32>
    %5 = arith.mulf %3, %4 : vector<32x1xf32>
    %c0_3 = arith.constant 0 : index
    %c0_4 = arith.constant 0 : index
    %6 = vector.load %arg2[%c0_3, %c0_4] : memref<4x32xf32, #tpu.memory_space<vmem>>, vector<4x32xf32>
    %cst_5 = arith.constant dense<0.000000e+00> : vector<4x1xf32>
    %7 = tpu.matmul %6, %5, %cst_5 {dimension_numbers = #tpu.dot_dimension_numbers<[1], [0], [0], [1], [0, 0, 1, 1], [], []>} : vector<4x32xf32>, vector<32x1xf32>, vector<4x1xf32> -> vector<4x1xf32>
    %cst_6 = arith.constant 0.000000e+00 : f32
    %8 = vector.broadcast %cst_6 : f32 to vector<4x1xf32>
    %9 = arith.maximumf %7, %8 : vector<4x1xf32>
    %c0_7 = arith.constant 0 : index
    %c0_8 = arith.constant 0 : index
    %10 = vector.load %arg3[%c0_7, %c0_8] : memref<32x4xf32, #tpu.memory_space<vmem>>, vector<32x4xf32>
    %cst_9 = arith.constant dense<0.000000e+00> : vector<32x1xf32>
    %11 = tpu.matmul %10, %9, %cst_9 {dimension_numbers = #tpu.dot_dimension_numbers<[1], [0], [0], [1], [0, 0, 1, 1], [], []>} : vector<32x4xf32>, vector<4x1xf32>, vector<32x1xf32> -> vector<32x1xf32>
    %12 = arith.negf %11 : vector<32x1xf32>
    %13 = math.exp %12 : vector<32x1xf32>
    %cst_10 = arith.constant 1.000000e+00 : f32
    %14 = vector.broadcast %cst_10 : f32 to vector<32x1xf32>
    %15 = arith.addf %14, %13 : vector<32x1xf32>
    %16 = arith.divf %14, %15 : vector<32x1xf32>
    %c0_11 = arith.constant 0 : index
    %c0_12 = arith.constant 0 : index
    %c0_13 = arith.constant 0 : index
    %17 = vector.load %arg1[%c0_11, %c0_12, %c0_13] : memref<1x32x1024xf32, #tpu.memory_space<vmem>>, vector<1x32x1024xf32>
    %18 = vector.shape_cast %17 : vector<1x32x1024xf32> to vector<32x1024xf32>
    %19 = vector.broadcast %16 : vector<32x1xf32> to vector<32x1024xf32>
    %20 = arith.mulf %18, %19 : vector<32x1024xf32>
    %c0_14 = arith.constant 0 : index
    %c0_15 = arith.constant 0 : index
    %c0_16 = arith.constant 0 : index
    %21 = vector.load %arg4[%c0_14, %c0_15, %c0_16] : memref<1x32x1024xf32, #tpu.memory_space<vmem>>, vector<1x32x1024xf32>
    %22 = vector.shape_cast %21 : vector<1x32x1024xf32> to vector<32x1024xf32>
    %23 = vector.shape_cast %20 : vector<32x1024xf32> to vector<1x32x1024xf32>
    tpu.vector_store %arg4[%c0_14, %c0_15, %c0_16], %23 {strides = array<i32>} : memref<1x32x1024xf32, #tpu.memory_space<vmem>>, vector<1x32x1024xf32>,
    return
  }
  func.func @transform_0(%arg0: i32) -> (i32, i32, i32) {
    %c0_i32 = arith.constant 0 : i32
    %c0_i32_0 = arith.constant 0 : i32
    %c0_i32_1 = arith.constant 0 : i32
    return %arg0, %c0_i32, %c0_i32_0 : i32, i32, i32
  }
  func.func @transform_1(%arg0: i32) -> (i32, i32) {
    %c0_i32 = arith.constant 0 : i32
    %c0_i32_0 = arith.constant 0 : i32
    %c0_i32_1 = arith.constant 0 : i32
    return %c0_i32, %c0_i32_0 : i32, i32
  }
  func.func @transform_2(%arg0: i32) -> (i32, i32) {
    %c0_i32 = arith.constant 0 : i32
    %c0_i32_0 = arith.constant 0 : i32
    %c0_i32_1 = arith.constant 0 : i32
    return %c0_i32, %c0_i32_0 : i32, i32
  }
  func.func @transform_3(%arg0: i32) -> (i32, i32, i32) {
    %c0_i32 = arith.constant 0 : i32
    %c0_i32_0 = arith.constant 0 : i32
    %c0_i32_1 = arith.constant 0 : i32
    return %arg0, %c0_i32, %c0_i32_0 : i32, i32, i32
  }
}

</mosaic_0001>

<bundles_post_ra>
// kernel: squeeze_excitation.1
= control target key start
LH: loop header
LB: loop body
LE: loop exit
PB: predicated region body
PF: predicated region fallthrough
CT: control target
= control target key end

     0   :  { %s708_s12 = smov 0   ;;  %s943_s0 = inlined_call_operand.vmem [shape: f32[2,32,1024], index: 0, kind: input, shape index: {}]   ;;  %s944_s1 = inlined_call_operand.vmem [shape: f32[4,32], index: 1, kind: input, shape index: {}]   ;;  %s945_s2 = inlined_call_operand.vmem [shape: f32[32,4], index: 2, kind: input, shape index: {}]   ;;  %s946_s3 = inlined_call_operand.vmem [shape: f32[2,32,1024], index: 3, kind: output, shape index: {}]  }
   0x1 LB: > { %s588_s13 = sadd.s32 4294967295, %s682_s12   ;;  %p592_p0 = scmp.ge.s32.totalorder %s682_s12, 1  ;;  %s682_s12 = sphi %s708_s12, %s13_s12  }
   0x2   : > { %p137_p1 = scmp.lt.s32.totalorder %s682_s12, 3 }
   0x4   : > { %p138_p2 = pnand %p592_p0, %p137_p1 }
   0x5   : > { %p161_p3 = scmp.lt.s32.totalorder (!%p138_p2), %s588_s13, 1  ;;  %v684_v60 = vmov (!%p138_p2), 0.0|0.0   ;;  %vm685_vm0 = vmmov (!%p138_p2), 0   ;;  %v686_v61 = vmov (!%p138_p2), 0.0   ;;  %vm244_vm1 = vcmask (!%p138_p2), 261120  }
   0x6   : > { %141 = sbr.rel (%p138_p2) target bundleno = 789 (0x315), region = 32  ;;  %640 = vmatprep.subr.bf16.mxu0 (!%p138_p2), %v684_v60  ;;  %629 = vmatprep.mubr.msk.f32.mxu0 (!%p138_p2), %vm685_vm0, %v686_v61  ;;  %vm323_vm2 = vcmask (!%p138_p2), 31744   ;;  %vm336_vm3 = vcmask (!%p138_p2), 1043456  }
   0xd   : > { %s948_s13 = smov (!%p161_p3, %s588_s13), 1 }
   0xe   : > { %s609_s14 = sshll.u32 %s948_s13, 8 }
   0xf   : > { %s724_s17 = scalar_lea.vmem %s943_s0, %s609_s14  ;;  %s874_s30 = scalar_lea.vmem %s946_s3, %s609_s14 }
  0x10   : > { %v727_v0 = vld [vmem:[%s724_s17 + $0x80] sm:$0xff]  ;;  %v730_v1 = vld [vmem:[%s724_s17 + $0x88] sm:$0xff]  ;;  %v733_v2 = vld [vmem:[%s724_s17 + $0x90] sm:$0xff] }
  0x11   : > { %v221_v3 = vadd.f32 %v730_v1, %v727_v0  ;;  %v738_v4 = vld [vmem:[%s724_s17 + $0x98] sm:$0xff]  ;;  %v741_v5 = vld [vmem:[%s724_s17] sm:$0xff]  ;;  %v745_v7 = vld [vmem:[%s724_s17 + $0x8] sm:$0xff] }
  0x12   : > { %v748_v8 = vld [vmem:[%s724_s17 + $0x10] sm:$0xff]  ;;  %v751_v9 = vld [vmem:[%s724_s17 + $0xa0] sm:$0xff]  ;;  %v203_v10 = vadd.f32 %v745_v7, %v741_v5  ;;  %v757_v12 = vld [vmem:[%s724_s17 + $0x18] sm:$0xff] }
  0x13   : > { %v222_v6 = vadd.f32 %v221_v3, %v733_v2  ;;  %v760_v13 = vld [vmem:[%s724_s17 + $0xc0] sm:$0xff]  ;;  %v763_v14 = vld [vmem:[%s724_s17 + $0xc8] sm:$0xff]  ;;  %v770_v17 = vld [vmem:[%s724_s17 + $0xd0] sm:$0xff] }
  0x14   : > { %v766_v15 = vld [vmem:[%s724_s17 + $0xa8] sm:$0xff]  ;;  %v204_v16 = vadd.f32 %v203_v10, %v748_v8  ;;  %v230_v18 = vadd.f32 %v763_v14, %v760_v13  ;;  %v775_v19 = vld [vmem:[%s724_s17 + $0xb0] sm:$0xff]  ;;  %v779_v21 = vld [vmem:[%s724_s17 + $0x20] sm:$0xff] }
  0x15   : > { %v223_v11 = vadd.f32 %v222_v6, %v738_v4  ;;  %v782_v22 = vld [vmem:[%s724_s17 + $0xd8] sm:$0xff]  ;;  %v787_v25 = vld [vmem:[%s724_s17 + $0x40] sm:$0xff]  ;;  %v790_v26 = vld [vmem:[%s724_s17 + $0x48] sm:$0xff] }
  0x16   : > { %v205_v23 = vadd.f32 %v204_v16, %v757_v12  ;;  %v231_v24 = vadd.f32 %v230_v18, %v770_v17  ;;  %v793_v27 = vld [vmem:[%s724_s17 + $0x50] sm:$0xff]  ;;  %v797_v29 = vld [vmem:[%s724_s17 + $0x28] sm:$0xff]  ;;  %v800_v30 = vld [vmem:[%s724_s17 + $0xe0] sm:$0xff]  ;;  %v212_v31 = vadd.f32 %v790_v26, %v787_v25 }
  0x17   : > { %v224_v20 = vadd.f32 %v223_v11, %v751_v9  ;;  %v805_v32 = vld [vmem:[%s724_s17 + $0xb8] sm:$0xff]  ;;  %v814_v37 = vld [vmem:[%s724_s17 + $0x30] sm:$0xff]  ;;  %v817_v38 = vld [vmem:[%s724_s17 + $0xe8] sm:$0xff] }
  0x18   : > { %v206_v33 = vadd.f32 %v205_v23, %v779_v21  ;;  %v232_v34 = vadd.f32 %v231_v24, %v782_v22  ;;  %v810_v35 = vld [vmem:[%s724_s17 + $0x58] sm:$0xff]  ;;  %v213_v39 = vadd.f32 %v212_v31, %v793_v27  ;;  %v823_v42 = vld [vmem:[%s724_s17 + $0x60] sm:$0xff]  ;;  %v830_v45 = vld [vmem:[%s724_s17 + $0xf0] sm:$0xff] }
  0x19   : > { %v225_v28 = vadd.f32 %v224_v20, %v766_v15  ;;  %v827_v44 = vld [vmem:[%s724_s17 + $0x38] sm:$0xff]  ;;  %v836_v49 = vld [vmem:[%s724_s17 + $0x68] sm:$0xff]  ;;  %v845_v54 = vld [vmem:[%s724_s17 + $0x70] sm:$0xff] }
  0x1a   : > { %v207_v40 = vadd.f32 %v206_v33, %v797_v29  ;;  %v233_v41 = vadd.f32 %v232_v34, %v800_v30  ;;  %v214_v46 = vadd.f32 %v213_v39, %v810_v35  ;;  %v839_v50 = vld [vmem:[%s724_s17 + $0xf8] sm:$0xff]  ;;  %v243_v24 = vld [vmem:[%s944_s1] sm:$0xf]  ;;  %v321_v39 = vld [vmem:[%s945_s2 + $0x10] sm:$0xff] }
  0x1b   : > { %v226_v36 = vadd.f32 %v225_v28, %v775_v19  ;;  %v850_v57 = vld [vmem:[%s724_s17 + $0x78] sm:$0xff]  ;;  %v319_v28 = vld [vmem:[%s945_s2] sm:$0xff] }
  0x1c   : > { %v208_v47 = vadd.f32 %v207_v40, %v814_v37  ;;  %v234_v48 = vadd.f32 %v233_v41, %v817_v38  ;;  %v215_v51 = vadd.f32 %v214_v46, %v823_v42  ;;  %634 = vmatprep.mubr.msk.f32.mxu1 %vm323_vm2, %v319_v28  ;;  %v322_v40 = vld [vmem:[%s945_s2 + $0x18] sm:$0xff]  ;;  %v687_v41 = vmov 0  }
  0x1d   : > { %v227_v43 = vadd.f32 %v226_v36, %v805_v32  ;;  %v320_v36 = vld [vmem:[%s945_s2 + $0x8] sm:$0xff]  ;;  %659 = vset.pattern.permute.xlu1 %v687_v41  ;;  %658 = vset.pattern.permute.xlu0 %v687_v41 }
  0x1e   : > { %v209_v52 = vadd.f32 %v208_v47, %v827_v44  ;;  %v235_v53 = vadd.f32 %v234_v48, %v830_v45  ;;  %v216_v55 = vadd.f32 %v215_v51, %v836_v49 }
  0x1f   : > { %228 = vadd.xlane.f32.xlu1 %v227_v43 }
  0x20   : > { %210 = vadd.xlane.f32.xlu0 %v209_v52  ;;  %v236_v56 = vadd.f32 %v235_v53, %v839_v50  ;;  %v217_v58 = vadd.f32 %v216_v55, %v845_v54 }
  0x22   : > { %v218_v59 = vadd.f32 %v217_v58, %v850_v57 }
  0x23   : > { %237 = vadd.xlane.f32.xlu1 %v236_v56 }
  0x24   : > { %219 = vadd.xlane.f32.xlu0 %v218_v59 }
  0xac   : > { %v229_v62 = vpop.xlane.xlu1 %228 }
  0xad   : > { %v211_v63 = vpop.xlane.xlu0 %210  ;;  %v241_v16 = vmul.f32 0.0009765625, %v229_v62 }
  0xae   : > { %v239_v10 = vmul.f32 0.0009765625, %v211_v63 }
  0xb0   : > { %v238_v3 = vpop.xlane.xlu1 %237 }
  0xb1   : > { %v220_v6 = vpop.xlane.xlu0 %219  ;;  %v242_v18 = vmul.f32 0.0009765625, %v238_v3 }
  0xb2   : > { %v240_v11 = vmul.f32 0.0009765625, %v220_v6 }
  0xb3   : > { %v644_v23 = vpack.c.bf16 %v242_v18, %v241_v16 }
  0xb4   : > { %v641_v20 = vpack.c.bf16 %v240_v11, %v239_v10 }
  0xb6   : > { %642 = vmatpush3.bf16.msra.mxu0 %v641_v20 }
  0xb7   : > { %643 = vmatprep.subr.bf16.mxu0 %v684_v60 }
  0xba   : > { %645 = vmatpush3.bf16.msra.mxu0 %v644_v23 }
  0xbd   : > { %630 = vmatmul.mubr.msk.f32.vlgmr.msra.gmra.mrb[0].mxu0 %vm244_vm1, %v243_v24 }
 0x190   : > { %v314_v31 = vpop.f32.mrb[0].mxu0 }
 0x191   : > { %v318_v33 = vmax.f32 %v314_v31, 0.0  ;;  %v631_v34 = vpop.f32.mrb[1].mxu0 }
 0x193   : > { %632 = vmatprep.subr.msk.mxu1 %vm336_vm3, %v318_v33 }
 0x194   : > { %633 = vmatpush3.msk.msra.mxu1 %vm336_vm3, %v318_v33 }
 0x195   : > { %635 = vmatmul.mubr.msk.f32.vlgmr.msra.gmra.mrb[0].mxu1 %vm323_vm2, %v320_v36 }
 0x196   : > { %637 = vmatprep.mubr.msk.f32.mxu1 %vm323_vm2, %v321_v39 }
 0x199   : > { %638 = vmatmul.mubr.msk.f32.gmra.mrb[2].mxu1 %vm323_vm2, %v322_v40 }
 0x268   : > { %v636_v43 = vpop.f32.mrb[0].mxu1 }
 0x269   : > { %v604_v46 = vmul.f32 -1.442695, %v636_v43  ;;  %v406_v47 = vpop.f32.mrb[1].mxu1 }
 0x26a   : > { %v603_v48 = vmul.f32 -1.442695, %v406_v47 }
 0x26b   : > { %660 = vpow2.f32 %v604_v46 }
 0x26c   : > { %662 = vpow2.f32 %v603_v48  ;;  %v639_v51 = vpop.f32.mrb[2].mxu1 }
 0x26d   : > { %v606_v52 = vmul.f32 -1.442695, %v639_v51  ;;  %v416_v53 = vpop.f32.mrb[3].mxu1 }
 0x26e   : > { %v605_v55 = vmul.f32 -1.442695, %v416_v53 }
 0x26f   : > { %664 = vpow2.f32 %v606_v52 }
 0x270   : > { %666 = vpow2.f32 %v605_v55 }
 0x275   : > { %v661_v56 = vpop.eup %660 }
 0x276   : > { %v663_v58 = vpop.eup %662  ;;  %v438_v59 = vadd.f32 1.0, %v661_v56 }
 0x277   : > { %v437_v60 = vadd.f32 1.0, %v663_v58 }
 0x278   : > { %668 = vrcp.f32 %v438_v59 }
 0x279   : > { %v665_v61 = vpop.eup %664  ;;  %670 = vrcp.f32 %v437_v60 }
 0x27a   : > { %v667_v62 = vpop.eup %666  ;;  %v440_v3 = vadd.f32 1.0, %v665_v61 }
 0x27b   : > { %v439_v63 = vadd.f32 1.0, %v667_v62 }
 0x27d   : > { %672 = vrcp.f32 %v439_v63 }
 0x27e   : > { %674 = vrcp.f32 %v440_v3 }
 0x282   : > { %v669_v6 = vpop.eup %668 }
 0x283   : > { %v671_v10 = vpop.eup %670  ;;  %456 = vperm.xlu1 %659, %v669_v6  }
 0x284   : > { %451 = vperm.xlu0 %658, %v671_v10  }
 0x287   : > { %v673_v11 = vpop.eup %672 }
 0x288   : > { %461 = vperm.xlu1 %659, %v673_v11   ;;  %v675_v16 = vpop.eup %674 }
 0x28c   : > { %466 = vperm.xlu1 %659, %v675_v16  }
 0x302   : > { %v457_v18 = vpop.permute.xlu1 %456 }
 0x303   : > { %v477_v20 = vmul.f32 %v457_v18, %v787_v25  ;;  %v478_v23 = vmul.f32 %v457_v18, %v790_v26  ;;  %v479_v24 = vmul.f32 %v457_v18, %v793_v27  ;;  %v480_v28 = vmul.f32 %v457_v18, %v810_v35  ;;  %v452_v31 = vpop.permute.xlu0 %451 }
 0x304   : > { %v481_v33 = vmul.f32 %v457_v18, %v823_v42  ;;  %v482_v34 = vmul.f32 %v457_v18, %v836_v49  ;;  %v483_v36 = vmul.f32 %v457_v18, %v845_v54  ;;  %v484_v39 = vmul.f32 %v457_v18, %v850_v57 }
 0x305   : > { %509 = vst [vmem:[%s874_s30 + $0x40] sm:$0xff] %v477_v20  ;;  %510 = vst [vmem:[%s874_s30 + $0x48] sm:$0xff] %v478_v23  ;;  %v469_v25 = vmul.f32 %v452_v31, %v741_v5  ;;  %v470_v26 = vmul.f32 %v452_v31, %v745_v7  ;;  %v471_v27 = vmul.f32 %v452_v31, %v748_v8 }
 0x306   : > { %511 = vst [vmem:[%s874_s30 + $0x50] sm:$0xff] %v479_v24  ;;  %512 = vst [vmem:[%s874_s30 + $0x58] sm:$0xff] %v480_v28  ;;  %v472_v35 = vmul.f32 %v452_v31, %v757_v12  ;;  %v473_v42 = vmul.f32 %v452_v31, %v779_v21  ;;  %v474_v49 = vmul.f32 %v452_v31, %v797_v29 }
 0x307   : > { %513 = vst [vmem:[%s874_s30 + $0x60] sm:$0xff] %v481_v33  ;;  %514 = vst [vmem:[%s874_s30 + $0x68] sm:$0xff] %v482_v34  ;;  %v475_v5 = vmul.f32 %v452_v31, %v814_v37  ;;  %v476_v7 = vmul.f32 %v452_v31, %v827_v44  ;;  %v462_v8 = vpop.permute.xlu1 %461 }
 0x308   : > { %515 = vst [vmem:[%s874_s30 + $0x70] sm:$0xff] %v483_v36  ;;  %516 = vst [vmem:[%s874_s30 + $0x78] sm:$0xff] %v484_v39  ;;  %v485_v12 = vmul.f32 %v462_v8, %v727_v0  ;;  %v486_v21 = vmul.f32 %v462_v8, %v730_v1  ;;  %v487_v29 = vmul.f32 %v462_v8, %v733_v2 }
 0x309   : > { %501 = vst [vmem:[%s874_s30] sm:$0xff] %v469_v25  ;;  %502 = vst [vmem:[%s874_s30 + $0x8] sm:$0xff] %v470_v26  ;;  %v488_v37 = vmul.f32 %v462_v8, %v738_v4  ;;  %v489_v44 = vmul.f32 %v462_v8, %v751_v9  ;;  %v490_v54 = vmul.f32 %v462_v8, %v766_v15 }
 0x30a   : > { %503 = vst [vmem:[%s874_s30 + $0x10] sm:$0xff] %v471_v27  ;;  %504 = vst [vmem:[%s874_s30 + $0x18] sm:$0xff] %v472_v35  ;;  %v491_v57 = vmul.f32 %v462_v8, %v775_v19  ;;  %v492_v40 = vmul.f32 %v462_v8, %v805_v32 }
 0x30b   : > { %505 = vst [vmem:[%s874_s30 + $0x20] sm:$0xff] %v473_v42  ;;  %506 = vst [vmem:[%s874_s30 + $0x28] sm:$0xff] %v474_v49  ;;  %v467_v0 = vpop.permute.xlu1 %466 }
 0x30c   : > { %507 = vst [vmem:[%s874_s30 + $0x30] sm:$0xff] %v475_v5  ;;  %508 = vst [vmem:[%s874_s30 + $0x38] sm:$0xff] %v476_v7  ;;  %v493_v1 = vmul.f32 %v467_v0, %v760_v13  ;;  %v494_v2 = vmul.f32 %v467_v0, %v763_v14  ;;  %v495_v4 = vmul.f32 %v467_v0, %v770_v17 }
 0x30d   : > { %517 = vst [vmem:[%s874_s30 + $0x80] sm:$0xff] %v485_v12  ;;  %518 = vst [vmem:[%s874_s30 + $0x88] sm:$0xff] %v486_v21  ;;  %v496_v9 = vmul.f32 %v467_v0, %v782_v22  ;;  %v497_v15 = vmul.f32 %v467_v0, %v800_v30  ;;  %v498_v19 = vmul.f32 %v467_v0, %v817_v38 }
 0x30e   : > { %519 = vst [vmem:[%s874_s30 + $0x90] sm:$0xff] %v487_v29  ;;  %520 = vst [vmem:[%s874_s30 + $0x98] sm:$0xff] %v488_v37  ;;  %v499_v32 = vmul.f32 %v467_v0, %v830_v45  ;;  %v500_v41 = vmul.f32 %v467_v0, %v839_v50 }
 0x30f   : > { %521 = vst [vmem:[%s874_s30 + $0xa0] sm:$0xff] %v489_v44  ;;  %522 = vst [vmem:[%s874_s30 + $0xa8] sm:$0xff] %v490_v54 }
 0x310   : > { %523 = vst [vmem:[%s874_s30 + $0xb0] sm:$0xff] %v491_v57  ;;  %524 = vst [vmem:[%s874_s30 + $0xb8] sm:$0xff] %v492_v40 }
 0x311   : > { %525 = vst [vmem:[%s874_s30 + $0xc0] sm:$0xff] %v493_v1  ;;  %526 = vst [vmem:[%s874_s30 + $0xc8] sm:$0xff] %v494_v2 }
 0x312   : > { %527 = vst [vmem:[%s874_s30 + $0xd0] sm:$0xff] %v495_v4  ;;  %528 = vst [vmem:[%s874_s30 + $0xd8] sm:$0xff] %v496_v9 }
 0x313   : > { %529 = vst [vmem:[%s874_s30 + $0xe0] sm:$0xff] %v497_v15  ;;  %530 = vst [vmem:[%s874_s30 + $0xe8] sm:$0xff] %v498_v19 }
 0x314   : > { %531 = vst [vmem:[%s874_s30 + $0xf0] sm:$0xff] %v499_v32  ;;  %532 = vst [vmem:[%s874_s30 + $0xf8] sm:$0xff] %v500_v41 }
 0x315 PF: > { %s13_s12 = sadd.s32 1, %s682_s12  }
 0x316   : > { %p10_p4 = scmp.ge.s32.totalorder %s13_s12, 4  }
 0x318   :  { %12 = sbr.rel (!%p10_p4) target bundleno = 1 (0x1), region = 62 }

</bundles_post_ra>
